<compile_context>
chip_gen: v7x
topology: tpu7x:2x2x1
jax: 0.10.0
libtpu: 0.0.40
codegen_flags: <defaults>
</compile_context>

<pallas_src>
import jax
import jax.numpy as jnp
import numpy as np
from jax.experimental import pallas as pl
from jax.experimental.pallas import tpu as pltpu


def variational_sampler_kernel(x_ref, w_ref, b_ref, eps_ref, z_ref, loss_ref):
    hp = x_ref.shape[1]          # padded hidden size (lane-dense, multiple of 128)
    b = x_ref.shape[0]           # batch

    # Single fused matmul on the MXU: (B, Hp) @ (Hp, 2*Hp) -> (B, 2*Hp)
    x_bf = x_ref[...].astype(jnp.bfloat16)
    w_bf = w_ref[...].astype(jnp.bfloat16)
    y = jnp.dot(x_bf, w_bf, preferred_element_type=jnp.float32) + b_ref[...]

    act = jnp.tanh(y)            # f32 elementwise
    mean = act[:, :hp]           # 128-aligned column split
    logvar = act[:, hp:]

    # Reparameterize: z = mean + eps * exp(0.5 * logvar)
    std = jnp.exp(0.5 * logvar)
    z_ref[...] = (mean + eps_ref[...] * std).astype(z_ref.dtype)

    # KL: mean_b( -0.5 * sum_h(1 + logvar - mean^2 - exp(logvar)) )
    # Reuse exp(logvar) = std * std (saves one EUP exp per element).
    # Padded columns contribute 1 + 0 - 0 - 1 = 0, so summing over all Hp is exact.
    kl_terms = 1.0 + logvar - mean * mean - std * std
    kl_sum = -0.5 * jnp.sum(kl_terms)            # sum over batch and hidden
    loss_ref[0, 0] = kl_sum * (1.0 / b)          # scalar -> SMEM


def variational_sampler(x, wm, bm, wl, bl, eps, *, lane=128):
    """x: (B, H); wm/wl: (H, H) pre-transposed (in_dim, out_dim); bm/bl: (1, H); eps: (B, H)."""
    B, H = x.shape
    Hp = max(lane, ((H + lane - 1) // lane) * lane)
    ph = Hp - H

    # Lane-dense padding (zeros).  Padded weight rows/cols and bias cols are zero,
    # so padded outputs are tanh(0) = 0 and the KL over them is exactly zero.
    x_p = jnp.pad(x, ((0, 0), (0, ph)))
    eps_p = jnp.pad(eps, ((0, 0), (0, ph)))
    wm_p = jnp.pad(wm, ((0, ph), (0, ph)))
    wl_p = jnp.pad(wl, ((0, ph), (0, ph)))
    bm_p = jnp.pad(bm, ((0, 0), (0, ph)))
    bl_p = jnp.pad(bl, ((0, 0), (0, ph)))
    w_cat = jnp.concatenate([wm_p, wl_p], axis=1)   # (Hp, 2*Hp)
    b_cat = jnp.concatenate([bm_p, bl_p], axis=1)   # (1, 2*Hp)

    itemsize = 4
    bytes_accessed = itemsize * (
        B * Hp            # x
        + Hp * 2 * Hp     # w_cat
        + 2 * Hp          # b_cat
        + B * Hp          # eps
        + B * Hp          # z
        + 1               # loss
    )
    cost = pl.CostEstimate(
        flops=2 * B * Hp * (2 * Hp) + 12 * B * Hp,
        transcendentals=B * 2 * Hp + B * Hp,      # tanh + exp
        bytes_accessed=bytes_accessed,
    )

    z_p, loss = pl.pallas_call(
        variational_sampler_kernel,
        out_shape=(
            jax.ShapeDtypeStruct((B, Hp), x.dtype),
            jax.ShapeDtypeStruct((1, 1), jnp.float32),
        ),
        in_specs=[
            pl.BlockSpec(memory_space=pltpu.MemorySpace.VMEM),  # x
            pl.BlockSpec(memory_space=pltpu.MemorySpace.VMEM),  # w_cat
            pl.BlockSpec(memory_space=pltpu.MemorySpace.VMEM),  # b_cat
            pl.BlockSpec(memory_space=pltpu.MemorySpace.VMEM),  # eps
        ],
        out_specs=(
            pl.BlockSpec(memory_space=pltpu.MemorySpace.VMEM),  # z
            pl.BlockSpec(memory_space=pltpu.MemorySpace.SMEM),  # scalar loss
        ),
        cost_estimate=cost,
        # No grid: single invocation, whole (padded) arrays resident in VMEM.
        # TODO(synk): if this is ever tiled over a large batch, emit per-block
        # partial KL sums (reduced in the wrapper) instead of one scalar.
    )(x_p, w_cat, b_cat, eps_p)

    return z_p[:, :H], loss[0, 0]


def reference(x, wm, bm, wl, bl, eps):
    mean = jnp.tanh(x @ wm + bm)
    logvar = jnp.tanh(x @ wl + bl)
    z = mean + eps * jnp.exp(0.5 * logvar)
    loss = jnp.mean(-0.5 * jnp.sum(1 + logvar - mean**2 - jnp.exp(logvar), axis=1))
    return z, loss


if __name__ == "__main__":
    B, H = 8, 32  # small shapes: batch=8, hidden_size=32

    key = jax.random.PRNGKey(0)
    k_x, k_wm, k_bm, k_wl, k_bl, k_eps = jax.random.split(key, 6)

    # Deterministic "parameters" (nn.Linear(hidden, hidden) weight/bias shapes),
    # stored transposed as (H_in, H_out).
    bound = 1.0 / np.sqrt(H)
    x = jax.random.normal(k_x, (B, H), dtype=jnp.float32)
    wm = jax.random.uniform(k_wm, (H, H), jnp.float32, -bound, bound)
    bm = jax.random.uniform(k_bm, (1, H), jnp.float32, -bound, bound)
    wl = jax.random.uniform(k_wl, (H, H), jnp.float32, -bound, bound)
    bl = jax.random.uniform(k_bl, (1, H), jnp.float32, -bound, bound)
    # Gaussian noise for the reparameterization trick (torch.randn_like analogue).
    eps = jax.random.normal(k_eps, (B, H), dtype=jnp.float32)

    z, loss = variational_sampler(x, wm, bm, wl, bl, eps)
    jax.block_until_ready((z, loss))

    z_ref, loss_ref = reference(x, wm, bm, wl, bl, eps)
    assert z.shape == (B, H)
    assert np.allclose(np.asarray(z), np.asarray(z_ref), rtol=5e-2, atol=5e-2)
    assert np.allclose(float(loss), float(loss_ref), rtol=5e-2, atol=5e-2)
    assert np.all(np.isfinite(np.asarray(z))) and np.isfinite(float(loss))

    print("KERNEL_OK")
</pallas_src>

<mosaic_0001>
module attributes {stable_mosaic.version = 11 : i64} {
  func.func @variational_sampler_kernel(%arg0: memref<8x128xf32, #tpu.memory_space<vmem>>, %arg1: memref<128x256xf32, #tpu.memory_space<vmem>>, %arg2: memref<1x256xf32, #tpu.memory_space<vmem>>, %arg3: memref<8x128xf32, #tpu.memory_space<vmem>>, %arg4: memref<8x128xf32, #tpu.memory_space<vmem>>, %arg5: memref<1x1xf32, #tpu.memory_space<smem>>) attributes {dimension_semantics = [], scalar_prefetch = 0 : i64, scratch_operands = 0 : i64, tpu.core_type = #tpu.core_type<tc>} {
    %c0 = arith.constant 0 : index
    %c0_0 = arith.constant 0 : index
    %0 = vector.load %arg0[%c0, %c0_0] : memref<8x128xf32, #tpu.memory_space<vmem>>, vector<8x128xf32>
    %1 = arith.truncf %0 : vector<8x128xf32> to vector<8x128xbf16>
    %c0_1 = arith.constant 0 : index
    %c0_2 = arith.constant 0 : index
    %2 = vector.load %arg1[%c0_1, %c0_2] : memref<128x256xf32, #tpu.memory_space<vmem>>, vector<128x256xf32>
    %3 = arith.truncf %2 : vector<128x256xf32> to vector<128x256xbf16>
    %cst = arith.constant dense<0.000000e+00> : vector<8x256xf32>
    %4 = tpu.matmul %1, %3, %cst {dimension_numbers = #tpu.dot_dimension_numbers<[1], [0], [0], [1], [0, 0, 1, 1], [], []>} : vector<8x128xbf16>, vector<128x256xbf16>, vector<8x256xf32> -> vector<8x256xf32>
    %c0_3 = arith.constant 0 : index
    %c0_4 = arith.constant 0 : index
    %5 = vector.load %arg2[%c0_3, %c0_4] : memref<1x256xf32, #tpu.memory_space<vmem>>, vector<1x256xf32>
    %6 = vector.broadcast %5 : vector<1x256xf32> to vector<8x256xf32>
    %7 = arith.addf %4, %6 : vector<8x256xf32>
    %8 = math.tanh %7 : vector<8x256xf32>
    %9 = vector.extract_strided_slice %8 {offsets = [0, 0], sizes = [8, 128], strides = [1, 1]} : vector<8x256xf32> to vector<8x128xf32>
    %10 = vector.extract_strided_slice %8 {offsets = [0, 128], sizes = [8, 128], strides = [1, 1]} : vector<8x256xf32> to vector<8x128xf32>
    %cst_5 = arith.constant 5.000000e-01 : f32
    %11 = vector.broadcast %cst_5 : f32 to vector<8x128xf32>
    %12 = arith.mulf %11, %10 : vector<8x128xf32>
    %13 = math.exp %12 : vector<8x128xf32>
    %c0_6 = arith.constant 0 : index
    %c0_7 = arith.constant 0 : index
    %14 = vector.load %arg3[%c0_6, %c0_7] : memref<8x128xf32, #tpu.memory_space<vmem>>, vector<8x128xf32>
    %15 = arith.mulf %14, %13 : vector<8x128xf32>
    %16 = arith.addf %9, %15 : vector<8x128xf32>
    %c0_8 = arith.constant 0 : index
    %c0_9 = arith.constant 0 : index
    %17 = vector.load %arg4[%c0_8, %c0_9] : memref<8x128xf32, #tpu.memory_space<vmem>>, vector<8x128xf32>
    tpu.vector_store %arg4[%c0_8, %c0_9], %16 {strides = array<i32>} : memref<8x128xf32, #tpu.memory_space<vmem>>, vector<8x128xf32>,
    %cst_10 = arith.constant 1.000000e+00 : f32
    %18 = vector.broadcast %cst_10 : f32 to vector<8x128xf32>
    %19 = arith.addf %18, %10 : vector<8x128xf32>
    %20 = arith.mulf %9, %9 : vector<8x128xf32>
    %21 = arith.subf %19, %20 : vector<8x128xf32>
    %22 = arith.mulf %13, %13 : vector<8x128xf32>
    %23 = arith.subf %21, %22 : vector<8x128xf32>
    %24 = vector.shape_cast %23 : vector<8x128xf32> to vector<1x8x128xf32>
    %cst_11 = arith.constant dense<0.000000e+00> : vector<1xf32>
    %25 = vector.multi_reduction <add>, %24, %cst_11 [1, 2] : vector<1x8x128xf32> to vector<1xf32>
    %26 = vector.shape_cast %25 : vector<1xf32> to vector<1x1x1xf32>
    %27 = vector.extract %26[0, 0, 0] : f32 from vector<1x1x1xf32>
    %cst_12 = arith.constant -5.000000e-01 : f32
    %28 = arith.mulf %cst_12, %27 : f32
    %cst_13 = arith.constant 1.250000e-01 : f32
    %29 = arith.mulf %28, %cst_13 : f32
    %c0_14 = arith.constant 0 : index
    %c0_15 = arith.constant 0 : index
    %30 = memref.load %arg5[%c0_14, %c0_15] : memref<1x1xf32, #tpu.memory_space<smem>>
    memref.store %29, %arg5[%c0_14, %c0_15] : memref<1x1xf32, #tpu.memory_space<smem>>
    return
  }
}

</mosaic_0001>

<bundles_post_ra>
// kernel: tpu_custom_call.1
= control target key start
LH: loop header
LB: loop body
LE: loop exit
PB: predicated region body
PF: predicated region fallthrough
CT: control target
= control target key end

     0   :  { %11 = vsyncpa [#allocation3], 0  ;;  %s404_s0 = inlined_call_operand.hbm [shape: f32[8,128], index: 0, kind: input, shape index: {}]   ;;  %s405_s1 = inlined_call_operand.hbm [shape: f32[128,256], index: 1, kind: input, shape index: {}]   ;;  %s406_s2 = inlined_call_operand.vmem [shape: f32[1,256], index: 2, kind: input, shape index: {}]   ;;  %s407_s3 = inlined_call_operand.vmem [shape: f32[8,128], index: 3, kind: input, shape index: {}]   ;;  %s408_s4 = inlined_call_operand.hbm [shape: f32[8,128], index: 4, kind: output, shape index: {0}]   ;;  %s409_s5 = inlined_call_operand.hbm [shape: f32[1,1], index: 5, kind: output, shape index: {1}]  }
   0x1   :  { %12 = vsyncpa [#allocation7], 0 }
   0x2   :  { %13 = vsyncpa [#allocation4], 0 }
   0x3   :  { %14 = vsyncpa [#allocation5], 0  ;;  %s306_s18 = smov [#allocation2]   ;;  %s307_s20 = smov [#allocation6]  }
   0x4   :  { %s21_s19 = sshll.u32 %s306_s18, 4  ;;  %s30_s21 = sshll.u32 %s307_s20, 4  ;;  %s22_s19 = int_to_ptr.vmem [resolvable:$true] %s21_s19  ;;  %s343_s21 = int_to_ptr.vmem [resolvable:$true] %s30_s21 }
   0x5   :  { %s222_s24 = scalar_lea.hbm %s404_s0, 128 }
   0x6   :  { %p223_p0 = scmp.ne.s32.totalorder %s404_s0, %s222_s24  ;;  %p226_p1 = scmp.lt.u32.totalorder %s222_s24, %s404_s0 }
   0x8   :  { %p228_p2 = pnand %p226_p1, %p223_p0 }
   0xa   :  { %231 = shalt.err (!%p228_p2)
}
   0xb   :  { %s232_s29 = scalar_lea.vmem %s22_s19, 128  ;;  %p237_p4 = scmp.lt.s32.totalorder %s22_s19, %s22_s19 }
   0xc   :  { %p233_p3 = scmp.ne.s32.totalorder %s22_s19, %s232_s29  ;;  %p238_p5 = scmp.lt.s32.totalorder %s232_s29, %s232_s29 }
   0xe   :  { %p239_p6 = por %p238_p5, %p237_p4 }
  0x10   :  { %p240_p7 = pnand %p239_p6, %p233_p3 }
  0x12   :  { %243 = shalt.err (!%p240_p7)
}
  0x13   :  { %24 = dma.hbm_to_vmem [thread:$0]  %s404_s0, 128, %s22_s19, [#allocation3]  }
  0x14   :  { %s244_s9 = scalar_lea.hbm %s405_s1, 4096 }
  0x15   :  { %p245_p8 = scmp.ne.s32.totalorder %s405_s1, %s244_s9  ;;  %p248_p9 = scmp.lt.u32.totalorder %s244_s9, %s405_s1 }
  0x17   :  { %p250_p10 = pnand %p248_p9, %p245_p8 }
  0x19   :  { %253 = shalt.err (!%p250_p10)
}
  0x1a   :  { %s254_s14 = scalar_lea.vmem %s343_s21, 4096  ;;  %p259_p12 = scmp.lt.s32.totalorder %s343_s21, %s343_s21 }
  0x1b   :  { %p255_p11 = scmp.ne.s32.totalorder %s343_s21, %s254_s14  ;;  %p260_p13 = scmp.lt.s32.totalorder %s254_s14, %s254_s14 }
  0x1d   :  { %p261_p0 = por %p260_p13, %p259_p12 }
  0x1f   :  { %p262_p1 = pnand %p261_p0, %p255_p11 }
  0x21   :  { %265 = shalt.err (!%p262_p1)
}
  0x22   :  { %s308_s0 = smov 256   ;;  %s309_s15 = smov 16  }
  0x23   :  { %36 = dma.hbm_to_vmem [thread:$0]  %s405_s1, 4096, %s343_s21, [#allocation7], %s308_s0, %s308_s0, %s309_s15  }
  0x24   :  { %298 = dma.done.wait [#allocation3], 128  }
  0x25   :  { %299 = vsyncadd [#allocation3], 4294967168 }
  0x26   :  { %300 = dma.done.wait [#allocation7], 4096  }
  0x27   :  { %301 = vsyncadd [#allocation7], 4294963200  ;;  %v310_v0 = vmov 0   ;;  %v51_v1 = vld [vmem:[#allocation6 + $0x8] sm:$0xff]  ;;  %v53_v2 = vld [vmem:[#allocation6 + $0x18] sm:$0xff]  ;;  %v100_v51 = vlaneseq  ;;  %s311_s20 = smov [#allocation8]  }
  0x28   :  { %142 = vmatprep.mubr.bf16.mxu0 %v310_v0  ;;  %v50_v3 = vld [vmem:[#allocation6] sm:$0xff]  ;;  %v83_v4 = vpack.c.bf16 %v53_v2, %v51_v1  ;;  %v52_v5 = vld [vmem:[#allocation6 + $0x10] sm:$0xff]  ;;  %v55_v6 = vld [vmem:[#allocation6 + $0x28] sm:$0xff]  ;;  %s184_s21 = sshll.u32 %s311_s20, 4  ;;  %s185_s21 = int_to_ptr.vmem [resolvable:$true] %s184_s21 }
  0x29   :  { %v57_v7 = vld [vmem:[#allocation6 + $0x38] sm:$0xff]  ;;  %v82_v8 = vpack.c.bf16 %v52_v5, %v50_v3  ;;  %v54_v10 = vld [vmem:[#allocation6 + $0x20] sm:$0xff]  ;;  %v56_v11 = vld [vmem:[#allocation6 + $0x30] sm:$0xff]  ;;  %v101_v52 = vshrl.u32 %v100_v51, 7  ;;  %s266_s22 = scalar_lea.vmem %s185_s21, 128  ;;  %p271_p3 = scmp.lt.s32.totalorder %s185_s21, %s185_s21 }
  0x2a   :  { %v85_v9 = vpack.c.bf16 %v57_v7, %v55_v6  ;;  %v59_v12 = vld [vmem:[#allocation6 + $0x48] sm:$0xff]  ;;  %110 = vmatprep.subr.bf16.mxu0 %v83_v4  ;;  %v61_v13 = vld [vmem:[#allocation6 + $0x58] sm:$0xff]  ;;  %v84_v14 = vpack.c.bf16 %v56_v11, %v54_v10  ;;  %v58_v16 = vld [vmem:[#allocation6 + $0x40] sm:$0xff]  ;;  %p267_p2 = scmp.ne.s32.totalorder %s185_s21, %s266_s22  ;;  %p272_p4 = scmp.lt.s32.totalorder %s266_s22, %s266_s22 }
  0x2b   :  { %111 = vmatpush1.bf16.msra.mxu0 %v82_v8  ;;  %v87_v15 = vpack.c.bf16 %v61_v13, %v59_v12  ;;  %v60_v17 = vld [vmem:[#allocation6 + $0x50] sm:$0xff]  ;;  %v63_v18 = vld [vmem:[#allocation6 + $0x68] sm:$0xff]  ;;  %v65_v19 = vld [vmem:[#allocation6 + $0x78] sm:$0xff]  ;;  %v102_v53 = vsub.s32 0, %v101_v52  ;;  %v106_v55 = vsub.s32 1, %v101_v52 }
  0x2c   :  { %112 = vmatprep.subr.bf16.mxu0 %v85_v9  ;;  %v86_v20 = vpack.c.bf16 %v60_v17, %v58_v16  ;;  %v89_v21 = vpack.c.bf16 %v65_v19, %v63_v18  ;;  %v62_v22 = vld [vmem:[#allocation6 + $0x60] sm:$0xff]  ;;  %v64_v23 = vld [vmem:[#allocation6 + $0x70] sm:$0xff]  ;;  %v67_v24 = vld [vmem:[#allocation6 + $0x88] sm:$0xff]  ;;  %p273_p5 = por %p272_p4, %p271_p3 }
  0x2d   :  { %v69_v25 = vld [vmem:[#allocation6 + $0x98] sm:$0xff]  ;;  %v88_v26 = vpack.c.bf16 %v64_v23, %v62_v22  ;;  %v66_v28 = vld [vmem:[#allocation6 + $0x80] sm:$0xff]  ;;  %v68_v29 = vld [vmem:[#allocation6 + $0x90] sm:$0xff] }
  0x2e   :  { %v91_v27 = vpack.c.bf16 %v69_v25, %v67_v24  ;;  %v71_v30 = vld [vmem:[#allocation6 + $0xa8] sm:$0xff]  ;;  %v73_v31 = vld [vmem:[#allocation6 + $0xb8] sm:$0xff]  ;;  %v90_v32 = vpack.c.bf16 %v68_v29, %v66_v28  ;;  %v70_v34 = vld [vmem:[#allocation6 + $0xa0] sm:$0xff]  ;;  %p274_p6 = pnand %p273_p5, %p267_p2 }
  0x2f   :  { %113 = vmatpush1.bf16.msra.mxu0 %v84_v14  ;;  %v93_v33 = vpack.c.bf16 %v73_v31, %v71_v30  ;;  %v72_v35 = vld [vmem:[#allocation6 + $0xb0] sm:$0xff]  ;;  %v75_v36 = vld [vmem:[#allocation6 + $0xc8] sm:$0xff]  ;;  %v77_v37 = vld [vmem:[#allocation6 + $0xd8] sm:$0xff] }
  0x30   :  { %114 = vmatprep.subr.bf16.mxu0 %v87_v15  ;;  %v92_v38 = vpack.c.bf16 %v72_v35, %v70_v34  ;;  %v95_v39 = vpack.c.bf16 %v77_v37, %v75_v36  ;;  %v74_v40 = vld [vmem:[#allocation6 + $0xc0] sm:$0xff]  ;;  %v76_v41 = vld [vmem:[#allocation6 + $0xd0] sm:$0xff]  ;;  %v79_v42 = vld [vmem:[#allocation6 + $0xe8] sm:$0xff] }
  0x31   :  { %v81_v43 = vld [vmem:[#allocation6 + $0xf8] sm:$0xff]  ;;  %v94_v44 = vpack.c.bf16 %v76_v41, %v74_v40  ;;  %v78_v46 = vld [vmem:[#allocation6 + $0xe0] sm:$0xff]  ;;  %v80_v47 = vld [vmem:[#allocation6 + $0xf0] sm:$0xff] }
  0x32   :  { %v97_v45 = vpack.c.bf16 %v81_v43, %v79_v42  ;;  %v96_v48 = vpack.c.bf16 %v80_v47, %v78_v46  ;;  %v48_v49 = vld [vmem:[#allocation2] sm:$0xff] }
  0x33   :  { %115 = vmatpush1.bf16.msra.mxu0 %v86_v20  ;;  %v49_v50 = vpack.c.bf16 %v48_v49, %v48_v49  ;;  %v98_v54 = vld [vmem:[%s406_s2] sm:$0x3] }
  0x34   :  { %116 = vmatprep.subr.bf16.mxu0 %v89_v21  ;;  %v103_v56 = vrot.slane %v98_v54, %v102_v53  ;;  %v107_v57 = vrot.slane %v98_v54, %v106_v55  ;;  %v156_v7 = vld [vmem:[%s407_s3] sm:$0xff] }
  0x37   :  { %117 = vmatpush1.bf16.msra.mxu0 %v88_v26 }
  0x38   :  { %118 = vmatprep.subr.bf16.mxu0 %v91_v27 }
  0x3b   :  { %119 = vmatpush1.bf16.msra.mxu0 %v90_v32 }
  0x3c   :  { %120 = vmatprep.subr.bf16.mxu0 %v93_v33 }
  0x3f   :  { %121 = vmatpush1.bf16.msra.mxu0 %v92_v38 }
  0x40   :  { %122 = vmatprep.subr.bf16.mxu0 %v95_v39 }
  0x43   :  { %123 = vmatpush1.bf16.msra.mxu0 %v94_v44 }
  0x44   :  { %124 = vmatprep.subr.bf16.mxu0 %v97_v45 }
  0x47   :  { %125 = vmatpush1.bf16.msra.mxu0 %v96_v48 }
  0x4a   :  { %143 = vmatmul.mubr.bf16.vlgmr.msra.gmra.mrb[0].mxu0 %v49_v50 }
 0x11d   :  { %v144_v58 = vpop.f32.mrb[0].mxu0 }
 0x11e   :  { %v145_v59 = vadd.f32 %v144_v58, %v103_v56  ;;  %v146_v60 = vpop.f32.mrb[1].mxu0 }
 0x11f   :  { %v147_v61 = vadd.f32 %v146_v60, %v107_v57  ;;  %v148_v62 = vpop.f32.mrb[2].mxu0 }
 0x120   :  { %216 = vtanh.f32 %v145_v59  ;;  %v149_v63 = vpop.f32.mrb[3].mxu0 }
 0x121   :  { %218 = vtanh.f32 %v147_v61 }
 0x12a   :  { %v217_v0 = vpop.eup %216 }
 0x12b   :  { %v219_v1 = vpop.eup %218  ;;  %v161_v2 = vmul.f32 %v217_v0, %v217_v0 }
 0x12c   :  { %v153_v3 = vmul.f32 0.5, %v219_v1  ;;  %v160_v4 = vadd.f32 1.0, %v219_v1 }
 0x12e   :  { %v154_v5 = vmul.f32 1.442695, %v153_v3  ;;  %v162_v6 = vsub.f32 %v160_v4, %v161_v2 }
 0x130   :  { %220 = vpow2.f32 %v154_v5 }
 0x13a   :  { %v221_v8 = vpop.eup %220 }
 0x13b   :  { %v163_v9 = vmul.f32 %v221_v8, %v221_v8  ;;  %v157_v10 = vmul.f32 %v221_v8, %v156_v7 }
 0x13d   :  { %v164_v11 = vsub.f32 %v162_v6, %v163_v9  ;;  %v158_v12 = vadd.f32 %v217_v0, %v157_v10 }
 0x13f   :  { %165 = vadd.xlane.f32.xlu0 %v164_v11  ;;  %159 = vst [vmem:[#allocation8] sm:$0xff] %v158_v12 }
 0x140   :  { %277 = shalt.err (!%p274_p6)
}
 0x141   :  { %s278_s3 = scalar_lea.hbm %s408_s4, 128 }
 0x142   :  { %p279_p7 = scmp.ne.s32.totalorder %s408_s4, %s278_s3  ;;  %p282_p8 = scmp.lt.u32.totalorder %s278_s3, %s408_s4 }
 0x144   :  { %p284_p9 = pnand %p282_p8, %p279_p7 }
 0x146   :  { %287 = shalt.err (!%p284_p9)
}
 0x147   :  { %187 = dma.vmem_to_hbm [thread:$0]  %s185_s21, 128, %s408_s4, [#allocation4]  }
 0x148   :  { %s288_s11 = scalar_lea.hbm %s409_s5, 16 }
 0x149   :  { %p289_p10 = scmp.ne.s32.totalorder %s409_s5, %s288_s11  ;;  %p292_p11 = scmp.lt.u32.totalorder %s288_s11, %s409_s5 }
 0x14b   :  { %p294_p12 = pnand %p292_p11, %p289_p10 }
 0x1cc   :  { %v166_v13 = vpop.xlane.xlu0 %165 }
 0x1cd   :  { %v167_v14 = vrot.slane %v166_v13, 4 }
 0x1cf   :  { %v168_v15 = vadd.f32 %v167_v14, %v166_v13 }
 0x1d1   :  { %v169_v16 = vrot.slane %v168_v15, 2 }
 0x1d3   :  { %v170_v17 = vadd.f32 %v169_v16, %v168_v15 }
 0x1d5   :  { %v171_v18 = vrot.slane %v170_v17, 1 }
 0x1d7   :  { %v172_v19 = vadd.f32 %v171_v18, %v170_v17 }
 0x1d9   :  { %207 = vpush %v172_v19 }
 0x20a   :  { %s208_s6 = spop %207 }
 0x20b   :  { %s174_s7 = smul.f32 -0.5, %s208_s6 }
 0x20d   :  { %s175_s8 = smul.f32 0.125, %s174_s7 }
 0x20f   :  { %177 = sst [smem:[#allocation9]] %s175_s8 }
 0x210   :  { %297 = shalt.err (!%p294_p12)
}
 0x211   :  { %s312_s0 = smov [#allocation9]  }
 0x212   :  { %195 = dma.smem_to_hbm %s312_s0, 16, %s409_s5, [#allocation5]  }
 0x213   :  { %302 = dma.done.wait [#allocation4], 128  }
 0x214   :  { %303 = vsyncadd [#allocation4], 4294967168 }
 0x215   :  { %304 = dma.done.wait [#allocation5], 16  }
 0x216   :  { %305 = vsyncadd [#allocation5], 4294967280 }
 0x217   :  { %202 = sfence }
 0x218   :  { %203 = vsyncpa [#allocation3], 1 }
 0x219   :  { %204 = vsyncpa [#allocation7], 1 }
 0x21a   :  { %205 = vsyncpa [#allocation4], 1 }
 0x21b   :  { %206 = vsyncpa [#allocation5], 1 }

</bundles_post_ra>
